<compile_context>
chip_gen: v5e
topology: v5e:2x2
jax: 0.10.0
libtpu: 0.0.40
codegen_flags: <defaults>
</compile_context>

<pallas_src>
import functools

import jax
import jax.numpy as jnp
from jax.experimental import pallas as pl
from jax.experimental.pallas import tpu as pltpu

DIN = 384   # path_input_dim ('small' -> [384, 256, 256])
HID = 256
NCLS = 2


def _sigmoid_via_tanh(z):
    # sigmoid(z) == 0.5 * (1 + tanh(z / 2)): one EUP op instead of exp + reciprocal.
    return 0.5 * (1.0 + jnp.tanh(0.5 * z))


# ---------------------------------------------------------------------------
# Kernel 1: per-region (local) phi + gated attention pool, TB regions per step.
#   h256   = relu(x @ Wphi + bphi)                                    (TB*N, HID)
#   scores = sum((tanh(h256 Wa + ba) * sigmoid(h256 Wb + bb)) * wc_row, -1)  (TB, N)
#   w      = softmax_N(scores)                                        (TB, N)
#   pooled = sum_n w[:, n] * h256[:, n, :]   == A_256 @ h_256         (TB, HID)
# ---------------------------------------------------------------------------
def _local_kernel(x_ref, wphi_ref, bphi_ref, wa_ref, ba_ref, wb_ref, bb_ref,
                  wc_ref, out_ref, *, tb, n, b_total):
    # bf16 cast happens here (not in the wrapper), so h is streamed from HBM exactly once.
    x = x_ref[...].astype(jnp.bfloat16)                                  # (tb*n, Din)
    h256 = jnp.dot(x, wphi_ref[...], preferred_element_type=jnp.float32) + bphi_ref[...]
    h256 = jnp.maximum(h256, 0.0)                                        # local_phi (dropout = id)
    hb = h256.astype(jnp.bfloat16)                                       # bf16 MXU operands, f32 math
    a = jnp.tanh(jnp.dot(hb, wa_ref[...], preferred_element_type=jnp.float32) + ba_ref[...])
    b = _sigmoid_via_tanh(
        jnp.dot(hb, wb_ref[...], preferred_element_type=jnp.float32) + bb_ref[...])
    gated = (a * b).reshape(tb, n, HID)
    # attention_c as VPU mul + lane reduce; its bias shifts every score within a
    # region equally -> softmax-invariant, dropped (exact).
    scores = jnp.sum(gated * wc_ref[...], axis=-1)                       # (tb, n), lane-dense
    # Mask tail regions of the last (partial) grid step: those rows come from
    # undefined data read past the end of h; keep them finite so exp never NaN/Infs.
    r = pl.program_id(0) * tb + jax.lax.broadcasted_iota(jnp.int32, (tb, n), 0)
    scores = jnp.where(r < b_total, scores, 0.0)
    scores = scores - jnp.max(scores, axis=-1, keepdims=True)            # softmax over patches
    e = jnp.exp(scores)
    w = e / jnp.sum(e, axis=-1, keepdims=True)                           # (tb, n)
    pooled = jnp.sum(w[:, :, None] * h256.reshape(tb, n, HID), axis=1)   # (tb, HID)
    out_ref[...] = pooled                                                # tail rows masked on store


# ---------------------------------------------------------------------------
# Kernel 2: global phi + gated attention pool over the B pooled vectors,
# then global_rho, classifier and softmax probabilities.
# ---------------------------------------------------------------------------
def _global_kernel(p_ref, wg_ref, bg_ref, wa_ref, ba_ref, wb_ref, bb_ref,
                   wc_ref, wr_ref, br_ref, wcl_ref, bcl_ref,
                   logits_ref, prob_ref):
    p = p_ref[...]                                                       # (B, HID) f32
    hg = jnp.maximum(
        jnp.dot(p, wg_ref[...], preferred_element_type=jnp.float32) + bg_ref[...], 0.0)
    a = jnp.tanh(jnp.dot(hg, wa_ref[...], preferred_element_type=jnp.float32) + ba_ref[...])
    b = _sigmoid_via_tanh(
        jnp.dot(hg, wb_ref[...], preferred_element_type=jnp.float32) + bb_ref[...])
    # attention_c as VPU mul + lane reduce (bias softmax-invariant -> dropped).
    scores = jnp.sum((a * b) * wc_ref[...], axis=-1, keepdims=True)      # (B, 1)
    scores = scores - jnp.max(scores, axis=0, keepdims=True)             # softmax over regions
    e = jnp.exp(scores)
    w = e / jnp.sum(e, axis=0, keepdims=True)                            # (B, 1)
    h_path = jnp.sum(w * hg, axis=0, keepdims=True)                      # (1, HID) == A_4096 @ h_4096
    h_path = jnp.maximum(
        jnp.dot(h_path, wr_ref[...], preferred_element_type=jnp.float32) + br_ref[...], 0.0)
    logits = jnp.dot(h_path, wcl_ref[...], preferred_element_type=jnp.float32) + bcl_ref[...]
    logits_ref[...] = logits
    m = jnp.max(logits, axis=1, keepdims=True)
    e2 = jnp.exp(logits - m)
    prob_ref[...] = e2 / jnp.sum(e2, axis=1, keepdims=True)


def _choose_tb(b, n, target_rows=1024):
    """Regions per grid step.

    Targets ~1k-2k MXU rows per step (amortizes the ~0.5 us per-grid-step pipeline
    overhead) while satisfying the (8, 128) tiling rule on both the (TB*N, Din)
    input block and the (TB, HID) output block: TB is a multiple of 8, or TB == B
    (single block covering the full array).
    """
    if b * n <= target_rows:
        return b                       # one step covers everything
    tb = max(1, target_rows // max(n, 1))
    tb = max(8, (tb // 8) * 8)         # multiple of 8 sublanes (rows become <= 8*N per step)
    return b if tb >= b else tb


def hipt_none_fc_forward(h, params):
    (wphi, bphi, wla, bla, wlb, blb, wlc, blc,
     wg, bg, wga, bga, wgb, bgb, wgc, bgc,
     wr, br, wcl, bcl) = params
    del blc, bgc  # attention_c biases: constant shift of all scores -> softmax no-op (exact)

    B, N, Din = h.shape
    TB = _choose_tb(B, N)
    grid = pl.cdiv(B, TB)

    # No jnp.pad and no wrapper-side dtype cast: the flattened f32 view is streamed
    # straight into the kernel (reshape is layout-free); bf16 cast happens in-kernel.
    h2 = h.reshape(B * N, Din)

    wphi_b = wphi.astype(jnp.bfloat16)
    wla_b = wla.astype(jnp.bfloat16)
    wlb_b = wlb.astype(jnp.bfloat16)
    wlc_row = wlc.reshape(1, HID)      # (HID,1) -> (1,HID) row for the VPU projection

    # Constant (grid-invariant) operands don't need double buffering.
    const = dict(pipeline_mode=pl.Buffered(1))

    rows = B * N
    local_cost = pl.CostEstimate(
        flops=2 * rows * (Din * HID + 2 * HID * HID) + 4 * rows * HID,
        transcendentals=rows * (2 * HID + 1),
        bytes_accessed=rows * Din * 4 + B * HID * 4
                       + 2 * (Din * HID + 2 * HID * HID) + 4 * 4 * HID,
    )

    local = functools.partial(_local_kernel, tb=TB, n=N, b_total=B)
    pooled = pl.pallas_call(
        local,
        out_shape=jax.ShapeDtypeStruct((B, HID), jnp.float32),
        grid_spec=pltpu.PrefetchScalarGridSpec(
            num_scalar_prefetch=0,
            grid=(grid,),
            in_specs=[
                pl.BlockSpec((TB * N, Din), lambda i: (i, 0)),
                pl.BlockSpec((Din, HID), lambda i: (0, 0), **const),
                pl.BlockSpec((1, HID), lambda i: (0, 0), **const),
                pl.BlockSpec((HID, HID), lambda i: (0, 0), **const),
                pl.BlockSpec((1, HID), lambda i: (0, 0), **const),
                pl.BlockSpec((HID, HID), lambda i: (0, 0), **const),
                pl.BlockSpec((1, HID), lambda i: (0, 0), **const),
                pl.BlockSpec((1, HID), lambda i: (0, 0), **const),
            ],
            out_specs=pl.BlockSpec((TB, HID), lambda i: (i, 0)),
        ),
        compiler_params=pltpu.CompilerParams(
            dimension_semantics=("parallel",),
            vmem_limit_bytes=48 * 1024 * 1024,
        ),
        cost_estimate=local_cost,
    )(h2, wphi_b, bphi, wla_b, bla, wlb_b, blb, wlc_row)

    # pooled is exactly (B, HID): the partial tail block's out-of-range rows are
    # masked on store, so no slicing / padding cleanup is needed.
    wgc_row = wgc.reshape(1, HID)
    logits, y_prob = pl.pallas_call(
        _global_kernel,
        out_shape=(jax.ShapeDtypeStruct((1, NCLS), jnp.float32),
                   jax.ShapeDtypeStruct((1, NCLS), jnp.float32)),
    )(pooled, wg, bg, wga, bga, wgb, bgb, wgc_row, wr, br, wcl, bcl)

    # torch.topk(logits, 1, dim=1)[1]  -> argmax indices (trivial int glue op)
    y_hat = jnp.argmax(logits, axis=1, keepdims=True).astype(jnp.int32)
    return logits, y_prob, y_hat, None, None


def init_params(key):
    ks = jax.random.split(key, 10)

    def lin(k, din, dout):
        kw, kb = jax.random.split(k)
        limit = 1.0 / jnp.sqrt(jnp.float32(din))
        w = jax.random.uniform(kw, (din, dout), jnp.float32, -limit, limit)
        b = jax.random.uniform(kb, (1, dout), jnp.float32, -limit, limit)
        return w, b

    wphi, bphi = lin(ks[0], DIN, HID)   # local_phi
    wla, bla = lin(ks[1], HID, HID)     # local attn a
    wlb, blb = lin(ks[2], HID, HID)     # local attn b
    wlc, blc = lin(ks[3], HID, 1)       # local attn c
    wg, bg = lin(ks[4], HID, HID)       # global_phi
    wga, bga = lin(ks[5], HID, HID)     # global attn a
    wgb, bgb = lin(ks[6], HID, HID)     # global attn b
    wgc, bgc = lin(ks[7], HID, 1)       # global attn c
    wr, br = lin(ks[8], HID, HID)       # global_rho
    wcl, bcl = lin(ks[9], HID, NCLS)    # classifier
    return (wphi, bphi, wla, bla, wlb, blb, wlc, blc,
            wg, bg, wga, bga, wgb, bgb, wgc, bgc, wr, br, wcl, bcl)


if __name__ == "__main__":
    key = jax.random.PRNGKey(0)
    k_in, k_par = jax.random.split(key)
    B, N = 2, 8
    h = jax.random.normal(k_in, (B, N, DIN), dtype=jnp.float32)
    params = init_params(k_par)

    logits, y_prob, y_hat, _, _ = hipt_none_fc_forward(h, params)
    jax.block_until_ready((logits, y_prob, y_hat))
    assert logits.shape == (1, NCLS) and y_prob.shape == (1, NCLS) and y_hat.shape == (1, 1)
    print("KERNEL_OK")
</pallas_src>

<mosaic_0001>
module attributes {stable_mosaic.version = 11 : i64} {
  func.func @_local_kernel(%arg0: i32, %arg1: memref<16x384xf32, #tpu.memory_space<vmem>>, %arg2: memref<384x256xbf16, #tpu.memory_space<vmem>>, %arg3: memref<1x256xf32, #tpu.memory_space<vmem>>, %arg4: memref<256x256xbf16, #tpu.memory_space<vmem>>, %arg5: memref<1x256xf32, #tpu.memory_space<vmem>>, %arg6: memref<256x256xbf16, #tpu.memory_space<vmem>>, %arg7: memref<1x256xf32, #tpu.memory_space<vmem>>, %arg8: memref<1x256xf32, #tpu.memory_space<vmem>>, %arg9: memref<2x256xf32, #tpu.memory_space<vmem>>) attributes {dimension_semantics = [#tpu.dimension_semantics<parallel>], iteration_bounds = array<i64: 1>, scalar_prefetch = 0 : i64, scratch_operands = 0 : i64, tpu.core_type = #tpu.core_type<tc>, window_params = [{transform_indices = @transform_0, window_bounds = array<i64: 16, 384>}, {pipeline_mode = #tpu.pipeline_mode<synchronous>, transform_indices = @transform_1, window_bounds = array<i64: 384, 256>}, {pipeline_mode = #tpu.pipeline_mode<synchronous>, transform_indices = @transform_2, window_bounds = array<i64: 1, 256>}, {pipeline_mode = #tpu.pipeline_mode<synchronous>, transform_indices = @transform_3, window_bounds = array<i64: 256, 256>}, {pipeline_mode = #tpu.pipeline_mode<synchronous>, transform_indices = @transform_4, window_bounds = array<i64: 1, 256>}, {pipeline_mode = #tpu.pipeline_mode<synchronous>, transform_indices = @transform_5, window_bounds = array<i64: 256, 256>}, {pipeline_mode = #tpu.pipeline_mode<synchronous>, transform_indices = @transform_6, window_bounds = array<i64: 1, 256>}, {pipeline_mode = #tpu.pipeline_mode<synchronous>, transform_indices = @transform_7, window_bounds = array<i64: 1, 256>}, {transform_indices = @transform_8, window_bounds = array<i64: 2, 256>}]} {
    %c0 = arith.constant 0 : index
    %c0_0 = arith.constant 0 : index
    %0 = vector.load %arg1[%c0, %c0_0] : memref<16x384xf32, #tpu.memory_space<vmem>>, vector<16x384xf32>
    %1 = arith.truncf %0 : vector<16x384xf32> to vector<16x384xbf16>
    %c0_1 = arith.constant 0 : index
    %c0_2 = arith.constant 0 : index
    %2 = vector.load %arg2[%c0_1, %c0_2] : memref<384x256xbf16, #tpu.memory_space<vmem>>, vector<384x256xbf16>
    %cst = arith.constant dense<0.000000e+00> : vector<16x256xf32>
    %3 = tpu.matmul %1, %2, %cst {dimension_numbers = #tpu.dot_dimension_numbers<[1], [0], [0], [1], [0, 0, 1, 1], [], []>} : vector<16x384xbf16>, vector<384x256xbf16>, vector<16x256xf32> -> vector<16x256xf32>
    %c0_3 = arith.constant 0 : index
    %c0_4 = arith.constant 0 : index
    %4 = vector.load %arg3[%c0_3, %c0_4] : memref<1x256xf32, #tpu.memory_space<vmem>>, vector<1x256xf32>
    %5 = vector.broadcast %4 : vector<1x256xf32> to vector<16x256xf32>
    %6 = arith.addf %3, %5 : vector<16x256xf32>
    %cst_5 = arith.constant 0.000000e+00 : f32
    %7 = vector.broadcast %cst_5 : f32 to vector<16x256xf32>
    %8 = arith.maximumf %6, %7 : vector<16x256xf32>
    %9 = arith.truncf %8 : vector<16x256xf32> to vector<16x256xbf16>
    %c0_6 = arith.constant 0 : index
    %c0_7 = arith.constant 0 : index
    %10 = vector.load %arg4[%c0_6, %c0_7] : memref<256x256xbf16, #tpu.memory_space<vmem>>, vector<256x256xbf16>
    %cst_8 = arith.constant dense<0.000000e+00> : vector<16x256xf32>
    %11 = tpu.matmul %9, %10, %cst_8 {dimension_numbers = #tpu.dot_dimension_numbers<[1], [0], [0], [1], [0, 0, 1, 1], [], []>} : vector<16x256xbf16>, vector<256x256xbf16>, vector<16x256xf32> -> vector<16x256xf32>
    %c0_9 = arith.constant 0 : index
    %c0_10 = arith.constant 0 : index
    %12 = vector.load %arg5[%c0_9, %c0_10] : memref<1x256xf32, #tpu.memory_space<vmem>>, vector<1x256xf32>
    %13 = vector.broadcast %12 : vector<1x256xf32> to vector<16x256xf32>
    %14 = arith.addf %11, %13 : vector<16x256xf32>
    %15 = math.tanh %14 : vector<16x256xf32>
    %c0_11 = arith.constant 0 : index
    %c0_12 = arith.constant 0 : index
    %16 = vector.load %arg6[%c0_11, %c0_12] : memref<256x256xbf16, #tpu.memory_space<vmem>>, vector<256x256xbf16>
    %cst_13 = arith.constant dense<0.000000e+00> : vector<16x256xf32>
    %17 = tpu.matmul %9, %16, %cst_13 {dimension_numbers = #tpu.dot_dimension_numbers<[1], [0], [0], [1], [0, 0, 1, 1], [], []>} : vector<16x256xbf16>, vector<256x256xbf16>, vector<16x256xf32> -> vector<16x256xf32>
    %c0_14 = arith.constant 0 : index
    %c0_15 = arith.constant 0 : index
    %18 = vector.load %arg7[%c0_14, %c0_15] : memref<1x256xf32, #tpu.memory_space<vmem>>, vector<1x256xf32>
    %19 = vector.broadcast %18 : vector<1x256xf32> to vector<16x256xf32>
    %20 = arith.addf %17, %19 : vector<16x256xf32>
    %cst_16 = arith.constant 5.000000e-01 : f32
    %21 = vector.broadcast %cst_16 : f32 to vector<16x256xf32>
    %22 = arith.mulf %21, %20 : vector<16x256xf32>
    %23 = math.tanh %22 : vector<16x256xf32>
    %cst_17 = arith.constant 1.000000e+00 : f32
    %24 = vector.broadcast %cst_17 : f32 to vector<16x256xf32>
    %25 = arith.addf %24, %23 : vector<16x256xf32>
    %cst_18 = arith.constant 5.000000e-01 : f32
    %26 = vector.broadcast %cst_18 : f32 to vector<16x256xf32>
    %27 = arith.mulf %26, %25 : vector<16x256xf32>
    %28 = arith.mulf %15, %27 : vector<16x256xf32>
    %29 = vector.shape_cast %28 : vector<16x256xf32> to vector<2x8x256xf32>
    %c0_19 = arith.constant 0 : index
    %c0_20 = arith.constant 0 : index
    %30 = vector.load %arg8[%c0_19, %c0_20] : memref<1x256xf32, #tpu.memory_space<vmem>>, vector<1x256xf32>
    %31 = vector.shape_cast %30 : vector<1x256xf32> to vector<1x1x256xf32>
    %32 = vector.broadcast %31 : vector<1x1x256xf32> to vector<2x8x256xf32>
    %33 = arith.mulf %29, %32 : vector<2x8x256xf32>
    %cst_21 = arith.constant dense<0.000000e+00> : vector<2x8xf32>
    %34 = vector.multi_reduction <add>, %33, %cst_21 [2] : vector<2x8x256xf32> to vector<2x8xf32>
    %c2_i32 = arith.constant 2 : i32
    %35 = arith.muli %arg0, %c2_i32 : i32
    %36 = tpu.iota {dimensions = array<i32: 0>} : vector<2x8xi32>
    %37 = vector.broadcast %35 : i32 to vector<2x8xi32>
    %38 = arith.addi %37, %36 : vector<2x8xi32>
    %c2_i32_22 = arith.constant 2 : i32
    %39 = vector.broadcast %c2_i32_22 : i32 to vector<2x8xi32>
    %40 = arith.cmpi slt, %38, %39 : vector<2x8xi32>
    %cst_23 = arith.constant 0.000000e+00 : f32
    %41 = vector.broadcast %cst_23 : f32 to vector<2x8xf32>
    %42 = arith.select %40, %34, %41 : vector<2x8xi1>, vector<2x8xf32>
    %cst_24 = arith.constant dense<0xFF800000> : vector<2xf32>
    %43 = vector.multi_reduction <maximumf>, %42, %cst_24 [1] : vector<2x8xf32> to vector<2xf32>
    %44 = vector.shape_cast %43 : vector<2xf32> to vector<2x1xf32>
    %45 = vector.broadcast %44 : vector<2x1xf32> to vector<2x8xf32>
    %46 = arith.subf %42, %45 : vector<2x8xf32>
    %47 = math.exp %46 : vector<2x8xf32>
    %cst_25 = arith.constant dense<0.000000e+00> : vector<2xf32>
    %48 = vector.multi_reduction <add>, %47, %cst_25 [1] : vector<2x8xf32> to vector<2xf32>
    %49 = vector.shape_cast %48 : vector<2xf32> to vector<2x1xf32>
    %50 = vector.broadcast %49 : vector<2x1xf32> to vector<2x8xf32>
    %51 = arith.divf %47, %50 : vector<2x8xf32>
    %52 = vector.shape_cast %51 : vector<2x8xf32> to vector<2x8x1xf32>
    %53 = vector.shape_cast %8 : vector<16x256xf32> to vector<2x8x256xf32>
    %54 = vector.broadcast %52 : vector<2x8x1xf32> to vector<2x8x256xf32>
    %55 = arith.mulf %54, %53 : vector<2x8x256xf32>
    %cst_26 = arith.constant dense<0.000000e+00> : vector<2x256xf32>
    %56 = vector.multi_reduction <add>, %55, %cst_26 [1] : vector<2x8x256xf32> to vector<2x256xf32>
    %c0_27 = arith.constant 0 : index
    %c0_28 = arith.constant 0 : index
    %57 = vector.load %arg9[%c0_27, %c0_28] : memref<2x256xf32, #tpu.memory_space<vmem>>, vector<2x256xf32>
    tpu.vector_store %arg9[%c0_27, %c0_28], %56 {strides = array<i32>} : memref<2x256xf32, #tpu.memory_space<vmem>>, vector<2x256xf32>,
    return
  }
  func.func @transform_0(%arg0: i32) -> (i32, i32) {
    %c0_i32 = arith.constant 0 : i32
    %c0_i32_0 = arith.constant 0 : i32
    return %arg0, %c0_i32 : i32, i32
  }
  func.func @transform_1(%arg0: i32) -> (i32, i32) {
    %c0_i32 = arith.constant 0 : i32
    %c0_i32_0 = arith.constant 0 : i32
    %c0_i32_1 = arith.constant 0 : i32
    return %c0_i32, %c0_i32_0 : i32, i32
  }
  func.func @transform_2(%arg0: i32) -> (i32, i32) {
    %c0_i32 = arith.constant 0 : i32
    %c0_i32_0 = arith.constant 0 : i32
    %c0_i32_1 = arith.constant 0 : i32
    return %c0_i32, %c0_i32_0 : i32, i32
  }
  func.func @transform_3(%arg0: i32) -> (i32, i32) {
    %c0_i32 = arith.constant 0 : i32
    %c0_i32_0 = arith.constant 0 : i32
    %c0_i32_1 = arith.constant 0 : i32
    return %c0_i32, %c0_i32_0 : i32, i32
  }
  func.func @transform_4(%arg0: i32) -> (i32, i32) {
    %c0_i32 = arith.constant 0 : i32
    %c0_i32_0 = arith.constant 0 : i32
    %c0_i32_1 = arith.constant 0 : i32
    return %c0_i32, %c0_i32_0 : i32, i32
  }
  func.func @transform_5(%arg0: i32) -> (i32, i32) {
    %c0_i32 = arith.constant 0 : i32
    %c0_i32_0 = arith.constant 0 : i32
    %c0_i32_1 = arith.constant 0 : i32
    return %c0_i32, %c0_i32_0 : i32, i32
  }
  func.func @transform_6(%arg0: i32) -> (i32, i32) {
    %c0_i32 = arith.constant 0 : i32
    %c0_i32_0 = arith.constant 0 : i32
    %c0_i32_1 = arith.constant 0 : i32
    return %c0_i32, %c0_i32_0 : i32, i32
  }
  func.func @transform_7(%arg0: i32) -> (i32, i32) {
    %c0_i32 = arith.constant 0 : i32
    %c0_i32_0 = arith.constant 0 : i32
    %c0_i32_1 = arith.constant 0 : i32
    return %c0_i32, %c0_i32_0 : i32, i32
  }
  func.func @transform_8(%arg0: i32) -> (i32, i32) {
    %c0_i32 = arith.constant 0 : i32
    %c0_i32_0 = arith.constant 0 : i32
    return %arg0, %c0_i32 : i32, i32
  }
}

</mosaic_0001>

<bundles_post_ra>
// kernel: tpu_custom_call.1
= control target key start
LH: loop header
LB: loop body
LE: loop exit
PB: predicated region body
PF: predicated region fallthrough
CT: control target
= control target key end

     0   :  { %13 = vsyncpa [#allocation3], 0  ;;  %s2049_s0 = inlined_call_operand.hbm [shape: f32[16,384], index: 0, kind: input, shape index: {}]   ;;  %s2050_s1 = inlined_call_operand.hbm [shape: bf16[384,256], index: 1, kind: input, shape index: {}]   ;;  %s2051_s2 = inlined_call_operand.hbm [shape: f32[1,256], index: 2, kind: input, shape index: {}]   ;;  %s2052_s3 = inlined_call_operand.hbm [shape: bf16[256,256], index: 3, kind: input, shape index: {}]   ;;  %s2053_s4 = inlined_call_operand.vmem [shape: f32[1,256], index: 4, kind: input, shape index: {}]   ;;  %s2054_s5 = inlined_call_operand.hbm [shape: bf16[256,256], index: 5, kind: input, shape index: {}]   ;;  %s2055_s6 = inlined_call_operand.vmem [shape: f32[1,256], index: 6, kind: input, shape index: {}]   ;;  %s2056_s7 = inlined_call_operand.vmem [shape: f32[1,256], index: 7, kind: input, shape index: {}]   ;;  %s2057_s8 = inlined_call_operand.hbm [shape: f32[2,256], index: 8, kind: output, shape index: {}]  }
   0x1   :  { %14 = vsyncpa [#allocation6], 0 }
   0x2   :  { %15 = vsyncpa [#allocation9], 0  ;;  %s34_s29 = sshll.u32 %s2050_s1, 4  ;;  %s35_s29 = int_to_ptr.hbm [resolvable:$true] %s34_s29 }
   0x3   :  { %16 = vsyncpa [#allocation4], 0  ;;  %s1916_s30 = smov [#allocation5]   ;;  %s58_s12 = sshll.u32 %s2052_s3, 4  ;;  %s59_s12 = int_to_ptr.hbm [resolvable:$true] %s58_s12 }
   0x4   :  { %s36_s9 = sshll.u32 %s1916_s30, 4  ;;  %s1917_s13 = smov 128   ;;  %s37_s9 = int_to_ptr.vmem [resolvable:$true] %s36_s9 }
   0x5   :  { %s1918_s14 = smov 8   ;;  %s1919_s15 = smov [#allocation8]  }
   0x6   :  { %42 = dma.hbm_to_vmem [thread:$0]  %s35_s29, 6144, %s37_s9, [#allocation6], %s1917_s13, %s1917_s13, %s1918_s14  }
   0x7   :  { %s60_s16 = sshll.u32 %s1919_s15, 4  ;;  %s21_s18 = sshll.u32 %s2049_s0, 4  ;;  %s61_s16 = int_to_ptr.vmem [resolvable:$true] %s60_s16  ;;  %s22_s18 = int_to_ptr.hbm [resolvable:$true] %s21_s18 }
   0x8   :  { %66 = dma.hbm_to_vmem [thread:$0]  %s59_s12, 4096, %s61_s16, [#allocation9], %s1917_s13, %s1917_s13, %s1918_s14  }
   0x9   :  { %s1920_s3 = smov [#allocation2]   ;;  %s48_s22 = sshll.u32 %s2051_s2, 4  ;;  %s49_s22 = int_to_ptr.hbm [resolvable:$true] %s48_s22 }
   0xa   :  { %s23_s19 = sshll.u32 %s1920_s3, 4  ;;  %s1921_s23 = smov 384   ;;  %s24_s19 = int_to_ptr.vmem [resolvable:$true] %s23_s19 }
   0xb   :  { %s1922_s24 = smov 24   ;;  %s1923_s25 = smov [#allocation7]  }
   0xc   :  { %29 = dma.hbm_to_vmem [thread:$0]  %s22_s18, 768, %s24_s19, [#allocation3], %s1921_s23, %s1921_s23, %s1922_s24  }
   0xd   :  { %s50_s26 = sshll.u32 %s1923_s25, 4  ;;  %s73_s28 = sshll.u32 %s2054_s5, 4  ;;  %s51_s26 = int_to_ptr.vmem [resolvable:$true] %s50_s26  ;;  %s74_s28 = int_to_ptr.hbm [resolvable:$true] %s73_s28 }
   0xe   :  { %53 = dma.hbm_to_vmem [thread:$0]  %s49_s22, 32, %s51_s26, [#allocation6]  }
   0xf   :  { %s1924_s29 = smov [#allocation10]  }
  0x10   :  { %s75_s30 = sshll.u32 %s1924_s29, 4  ;;  %s76_s30 = int_to_ptr.vmem [resolvable:$true] %s75_s30 }
  0x11   :  { %81 = dma.hbm_to_vmem [thread:$0]  %s74_s28, 4096, %s76_s30, [#allocation9], %s1917_s13, %s1917_s13, %s1918_s14  }
  0x12   :  { %1908 = dma.done.wait [#allocation3], 768  }
  0x13   :  { %1909 = vsyncadd [#allocation3], 4294966528 }
  0x14   :  { %1910 = dma.done.wait [#allocation6], 6176  }
  0x15   :  { %1911 = vsyncadd [#allocation6], 4294961120 }
  0x16   :  { %1912 = dma.done.wait [#allocation9], 8192  }
  0x17   :  { %1913 = vsyncadd [#allocation9], 4294959104  ;;  %v1230_v0 = vld [vmem:[#allocation5 + $0x70] sm:$0xf]  ;;  %v1635_v1 = vld [vmem:[#allocation5 + $0x74] sm:$0xf0] }
  0x18   :  { %v1294_v2 = vld [vmem:[#allocation5 + $0xf0] sm:$0xf]  ;;  %v1231_v3 = vor.u32 %v1635_v1, %v1230_v0  ;;  %v1651_v4 = vld [vmem:[#allocation5 + $0xf4] sm:$0xf0]  ;;  %v1222_v9 = vld [vmem:[#allocation5 + $0x60] sm:$0xf] }
  0x19   :  { %v1358_v5 = vld [vmem:[#allocation5 + $0x170] sm:$0xf]  ;;  %v1667_v6 = vld [vmem:[#allocation5 + $0x174] sm:$0xf0]  ;;  %v1295_v7 = vor.u32 %v1651_v4, %v1294_v2  ;;  %v1633_v10 = vld [vmem:[#allocation5 + $0x64] sm:$0xf0] }
  0x1a   :  { %v1359_v8 = vor.u32 %v1667_v6, %v1358_v5  ;;  %v1286_v11 = vld [vmem:[#allocation5 + $0xe0] sm:$0xf]  ;;  %409 = vmatpush.bf16.msra.mxu0 %v1231_v3  ;;  %v1223_v12 = vor.u32 %v1633_v10, %v1222_v9  ;;  %v1649_v13 = vld [vmem:[#allocation5 + $0xe4] sm:$0xf0]  ;;  %v1214_v18 = vld [vmem:[#allocation5 + $0x50] sm:$0xf] }
  0x1b   :  { %v1350_v14 = vld [vmem:[#allocation5 + $0x160] sm:$0xf]  ;;  %v1665_v15 = vld [vmem:[#allocation5 + $0x164] sm:$0xf0]  ;;  %423 = vmatpush.bf16.msra.mxu1 %v1295_v7  ;;  %v1287_v16 = vor.u32 %v1649_v13, %v1286_v11  ;;  %v1631_v19 = vld [vmem:[#allocation5 + $0x54] sm:$0xf0] }
  0x1c   :  { %437 = vmatpush.bf16.msra.mxu2 %v1359_v8  ;;  %v1351_v17 = vor.u32 %v1665_v15, %v1350_v14  ;;  %v1278_v20 = vld [vmem:[#allocation5 + $0xd0] sm:$0xf]  ;;  %v1647_v21 = vld [vmem:[#allocation5 + $0xd4] sm:$0xf0]  ;;  %v1215_v24 = vor.u32 %v1631_v19, %v1214_v18  ;;  %v1206_v25 = vld [vmem:[#allocation5 + $0x40] sm:$0xf] }
  0x1d   :  { %v1342_v22 = vld [vmem:[#allocation5 + $0x150] sm:$0xf]  ;;  %v1663_v23 = vld [vmem:[#allocation5 + $0x154] sm:$0xf0]  ;;  %v1629_v26 = vld [vmem:[#allocation5 + $0x44] sm:$0xf0]  ;;  %v1279_v27 = vor.u32 %v1647_v21, %v1278_v20 }
  0x1e   :  { %410 = vmatpush.bf16.msra.mxu0 %v1223_v12  ;;  %v1343_v28 = vor.u32 %v1663_v23, %v1342_v22  ;;  %v1270_v29 = vld [vmem:[#allocation5 + $0xc0] sm:$0xf]  ;;  %v1634_v30 = vld [vmem:[#allocation5 + $0x74] sm:$0xf]  ;;  %v1232_v31 = vld [vmem:[#allocation5 + $0x78] sm:$0xf0]  ;;  %v1207_v37 = vor.u32 %v1629_v26, %v1206_v25 }
  0x1f   :  { %424 = vmatpush.bf16.msra.mxu1 %v1287_v16  ;;  %v1645_v32 = vld [vmem:[#allocation5 + $0xc4] sm:$0xf0]  ;;  %v1334_v33 = vld [vmem:[#allocation5 + $0x140] sm:$0xf]  ;;  %v1235_v35 = vor.u32 %v1634_v30, %v1232_v31  ;;  %v1632_v36 = vld [vmem:[#allocation5 + $0x64] sm:$0xf] }
  0x20   :  { %438 = vmatpush.bf16.msra.mxu2 %v1351_v17  ;;  %v1661_v34 = vld [vmem:[#allocation5 + $0x144] sm:$0xf0]  ;;  %v1198_v38 = vld [vmem:[#allocation5 + $0x30] sm:$0xf]  ;;  %v1627_v39 = vld [vmem:[#allocation5 + $0x34] sm:$0xf0]  ;;  %v1271_v41 = vor.u32 %v1645_v32, %v1270_v29 }
  0x21   :  { %451 = vmatpush.bf16.msra.mxu3 %v1235_v35  ;;  %v1224_v40 = vld [vmem:[#allocation5 + $0x68] sm:$0xf0]  ;;  %v1335_v42 = vor.u32 %v1661_v34, %v1334_v33  ;;  %v1262_v43 = vld [vmem:[#allocation5 + $0xb0] sm:$0xf]  ;;  %v1643_v44 = vld [vmem:[#allocation5 + $0xb4] sm:$0xf0]  ;;  %v1199_v50 = vor.u32 %v1627_v39, %v1198_v38 }
  0x22   :  { %411 = vmatpush.bf16.msra.mxu0 %v1215_v24  ;;  %v1326_v45 = vld [vmem:[#allocation5 + $0x130] sm:$0xf]  ;;  %v1227_v46 = vor.u32 %v1632_v36, %v1224_v40  ;;  %v1659_v47 = vld [vmem:[#allocation5 + $0x134] sm:$0xf0]  ;;  %v1630_v48 = vld [vmem:[#allocation5 + $0x54] sm:$0xf]  ;;  %v1263_v54 = vor.u32 %v1643_v44, %v1262_v43 }
  0x23   :  { %425 = vmatpush.bf16.msra.mxu1 %v1279_v27  ;;  %v1216_v49 = vld [vmem:[#allocation5 + $0x58] sm:$0xf0]  ;;  %v1190_v51 = vld [vmem:[#allocation5 + $0x20] sm:$0xf]  ;;  %v1625_v52 = vld [vmem:[#allocation5 + $0x24] sm:$0xf0]  ;;  %v1327_v55 = vor.u32 %v1659_v47, %v1326_v45 }
  0x24   :  { %439 = vmatpush.bf16.msra.mxu2 %v1343_v28  ;;  %v1219_v53 = vor.u32 %v1630_v48, %v1216_v49  ;;  %v1254_v56 = vld [vmem:[#allocation5 + $0xa0] sm:$0xf]  ;;  %v1628_v57 = vld [vmem:[#allocation5 + $0x44] sm:$0xf]  ;;  %v1208_v58 = vld [vmem:[#allocation5 + $0x48] sm:$0xf0]  ;;  %v1191_v62 = vor.u32 %v1625_v52, %v1190_v51 }
  0x25   :  { %452 = vmatpush.bf16.msra.mxu3 %v1227_v46  ;;  %v1641_v59 = vld [vmem:[#allocation5 + $0xa4] sm:$0xf0]  ;;  %v1318_v60 = vld [vmem:[#allocation5 + $0x120] sm:$0xf]  ;;  %v1182_v63 = vld [vmem:[#allocation5 + $0x10] sm:$0xf]  ;;  %v1211_v1 = vor.u32 %v1628_v57, %v1208_v58 }
  0x26   :  { %412 = vmatpush.bf16.msra.mxu0 %v1207_v37  ;;  %v1657_v61 = vld [vmem:[#allocation5 + $0x124] sm:$0xf0]  ;;  %v1623_v0 = vld [vmem:[#allocation5 + $0x14] sm:$0xf0]  ;;  %v1255_v2 = vor.u32 %v1641_v59, %v1254_v56  ;;  %v1246_v4 = vld [vmem:[#allocation5 + $0x90] sm:$0xf] }
  0x27   :  { %426 = vmatpush.bf16.msra.mxu1 %v1271_v41  ;;  %v1319_v3 = vor.u32 %v1657_v61, %v1318_v60  ;;  %v1626_v5 = vld [vmem:[#allocation5 + $0x34] sm:$0xf]  ;;  %v1200_v6 = vld [vmem:[#allocation5 + $0x38] sm:$0xf0]  ;;  %v1639_v7 = vld [vmem:[#allocation5 + $0x94] sm:$0xf0]  ;;  %v1183_v10 = vor.u32 %v1623_v0, %v1182_v63 }
  0x28   :  { %440 = vmatpush.bf16.msra.mxu2 %v1335_v42  ;;  %v1310_v8 = vld [vmem:[#allocation5 + $0x110] sm:$0xf]  ;;  %v1655_v9 = vld [vmem:[#allocation5 + $0x114] sm:$0xf0]  ;;  %v1174_v11 = vld [vmem:[#allocation5] sm:$0xf]  ;;  %v1203_v14 = vor.u32 %v1626_v5, %v1200_v6  ;;  %v1247_v15 = vor.u32 %v1639_v7, %v1246_v4 }
  0x29   :  { %453 = vmatpush.bf16.msra.mxu3 %v1219_v53  ;;  %v1621_v12 = vld [vmem:[#allocation5 + $0x4] sm:$0xf0]  ;;  %v1238_v13 = vld [vmem:[#allocation5 + $0x80] sm:$0xf]  ;;  %v1311_v16 = vor.u32 %v1655_v9, %v1310_v8  ;;  %v1624_v18 = vld [vmem:[#allocation5 + $0x24] sm:$0xf] }
  0x2a   :  { %413 = vmatpush.bf16.msra.mxu0 %v1199_v50  ;;  %v1637_v17 = vld [vmem:[#allocation5 + $0x84] sm:$0xf0]  ;;  %v1192_v19 = vld [vmem:[#allocation5 + $0x28] sm:$0xf0]  ;;  %v1302_v20 = vld [vmem:[#allocation5 + $0x100] sm:$0xf]  ;;  %v1175_v26 = vor.u32 %v1621_v12, %v1174_v11 }
  0x2b   :  { %427 = vmatpush.bf16.msra.mxu1 %v1263_v54  ;;  %v1653_v21 = vld [vmem:[#allocation5 + $0x104] sm:$0xf0]  ;;  %v1650_v22 = vld [vmem:[#allocation5 + $0xf4] sm:$0xf]  ;;  %v1296_v23 = vld [vmem:[#allocation5 + $0xf8] sm:$0xf0]  ;;  %v1195_v30 = vor.u32 %v1624_v18, %v1192_v19  ;;  %v1239_v31 = vor.u32 %v1637_v17, %v1238_v13 }
  0x2c   :  { %441 = vmatpush.bf16.msra.mxu2 %v1327_v55  ;;  %v1666_v24 = vld [vmem:[#allocation5 + $0x174] sm:$0xf]  ;;  %v1360_v25 = vld [vmem:[#allocation5 + $0x178] sm:$0xf0]  ;;  %v108_v27 = vld [vmem:[#allocation2 + $0x10] sm:$0xff]  ;;  %v1303_v32 = vor.u32 %v1653_v21, %v1302_v20  ;;  %v1299_v36 = vor.u32 %v1650_v22, %v1296_v23  ;;  %vm1059_vm0 = vcmask 1041409  }
  0x2d   :  { %454 = vmatpush.bf16.msra.mxu3 %v1211_v1  ;;  %v106_v28 = vld [vmem:[#allocation2] sm:$0xff]  ;;  %v109_v29 = vld [vmem:[#allocation2 + $0x18] sm:$0xff]  ;;  %v111_v33 = vld [vmem:[#allocation2 + $0x28] sm:$0xff]  ;;  %v1363_v37 = vor.u32 %v1666_v24, %v1360_v25  ;;  %vm1063_vm2 = vcmask 58368   ;;  %vm1136_vm7 = vcmask 1041408   ;;  %vm1145_vm8 = vcmask 1043459  }
  0x2e   :  { %414 = vmatpush.bf16.msra.mxu0 %v1191_v62  ;;  %v107_v34 = vld [vmem:[#allocation2 + $0x8] sm:$0xff]  ;;  %v110_v35 = vld [vmem:[#allocation2 + $0x20] sm:$0xff]  ;;  %v1648_v38 = vld [vmem:[#allocation5 + $0xe4] sm:$0xf]  ;;  %v112_v41 = vpack.c.bf16 %v109_v29, %v106_v28  ;;  %v1995_v45 = vpack.c.bf16 %v111_v33, %v108_v27  ;;  %vm1147_vm9 = vcmask 1045509   ;;  %s1160_s14 = sshll.u32 %s2057_s8, 4  ;;  %s1161_s14 = int_to_ptr.hbm [resolvable:$true] %s1160_s14 }
  0x2f   :  { %428 = vmatpush.bf16.msra.mxu1 %v1255_v2  ;;  %v1622_v39 = vld [vmem:[#allocation5 + $0x14] sm:$0xf]  ;;  %v1184_v40 = vld [vmem:[#allocation5 + $0x18] sm:$0xf0]  ;;  %v1288_v42 = vld [vmem:[#allocation5 + $0xe8] sm:$0xf0]  ;;  %v1997_v46 = vpack.c.bf16 %v110_v35, %v107_v34 }
  0x30   :  { %442 = vmatpush.bf16.msra.mxu2 %v1319_v3  ;;  %v1664_v43 = vld [vmem:[#allocation5 + $0x164] sm:$0xf]  ;;  %v1352_v44 = vld [vmem:[#allocation5 + $0x168] sm:$0xf0]  ;;  %v1187_v47 = vor.u32 %v1622_v39, %v1184_v40  ;;  %v1646_v48 = vld [vmem:[#allocation5 + $0xd4] sm:$0xf]  ;;  %v1291_v50 = vor.u32 %v1648_v38, %v1288_v42 }
  0x31   :  { %455 = vmatpush.bf16.msra.mxu3 %v1203_v14  ;;  %v1280_v49 = vld [vmem:[#allocation5 + $0xd8] sm:$0xf0]  ;;  %v1355_v51 = vor.u32 %v1664_v43, %v1352_v44  ;;  %v1662_v52 = vld [vmem:[#allocation5 + $0x154] sm:$0xf]  ;;  %v1620_v53 = vld [vmem:[#allocation5 + $0x4] sm:$0xf] }
  0x32   :  { %415 = vmatpush.bf16.msra.mxu0 %v1183_v10  ;;  %v1176_v54 = vld [vmem:[#allocation5 + $0x8] sm:$0xf0]  ;;  %v1344_v55 = vld [vmem:[#allocation5 + $0x158] sm:$0xf0]  ;;  %v1422_v56 = vld [vmem:[#allocation8 + $0x70] sm:$0xf]  ;;  %v1283_v62 = vor.u32 %v1646_v48, %v1280_v49 }
  0x33   :  { %429 = vmatpush.bf16.msra.mxu1 %v1247_v15  ;;  %v1683_v57 = vld [vmem:[#allocation8 + $0x74] sm:$0xf0]  ;;  %v1414_v59 = vld [vmem:[#allocation8 + $0x60] sm:$0xf]  ;;  %v1681_v60 = vld [vmem:[#allocation8 + $0x64] sm:$0xf0]  ;;  %v1179_v61 = vor.u32 %v1620_v53, %v1176_v54  ;;  %v1347_v63 = vor.u32 %v1662_v52, %v1344_v55 }
  0x34   :  { %443 = vmatpush.bf16.msra.mxu2 %v1311_v16  ;;  %v1423_v58 = vor.u32 %v1683_v57, %v1422_v56  ;;  %v1644_v0 = vld [vmem:[#allocation5 + $0xc4] sm:$0xf]  ;;  %v1272_v1 = vld [vmem:[#allocation5 + $0xc8] sm:$0xf0]  ;;  %v1415_v4 = vor.u32 %v1681_v60, %v1414_v59  ;;  %v1406_v5 = vld [vmem:[#allocation8 + $0x50] sm:$0xf] }
  0x35   :  { %456 = vmatpush.bf16.msra.mxu3 %v1195_v30  ;;  %v1660_v2 = vld [vmem:[#allocation5 + $0x144] sm:$0xf]  ;;  %v1336_v3 = vld [vmem:[#allocation5 + $0x148] sm:$0xf0]  ;;  %v1679_v6 = vld [vmem:[#allocation8 + $0x54] sm:$0xf0]  ;;  %v1275_v7 = vor.u32 %v1644_v0, %v1272_v1 }
  0x36   :  { %416 = vmatpush.bf16.msra.mxu0 %v1175_v26  ;;  %v1339_v8 = vor.u32 %v1660_v2, %v1336_v3  ;;  %v1642_v9 = vld [vmem:[#allocation5 + $0xb4] sm:$0xf]  ;;  %v1264_v10 = vld [vmem:[#allocation5 + $0xb8] sm:$0xf0]  ;;  %v1407_v13 = vor.u32 %v1679_v6, %v1406_v5  ;;  %v1398_v14 = vld [vmem:[#allocation8 + $0x40] sm:$0xf] }
  0x37   :  { %430 = vmatpush.bf16.msra.mxu1 %v1239_v31  ;;  %v1658_v11 = vld [vmem:[#allocation5 + $0x134] sm:$0xf]  ;;  %v1328_v12 = vld [vmem:[#allocation5 + $0x138] sm:$0xf0]  ;;  %v1677_v15 = vld [vmem:[#allocation8 + $0x44] sm:$0xf0]  ;;  %v1267_v16 = vor.u32 %v1642_v9, %v1264_v10 }
  0x38   :  { %444 = vmatpush.bf16.msra.mxu2 %v1303_v32  ;;  %v1331_v17 = vor.u32 %v1658_v11, %v1328_v12  ;;  %v1640_v18 = vld [vmem:[#allocation5 + $0xa4] sm:$0xf]  ;;  %v1256_v19 = vld [vmem:[#allocation5 + $0xa8] sm:$0xf0]  ;;  %v1399_v22 = vor.u32 %v1677_v15, %v1398_v14  ;;  %v1390_v23 = vld [vmem:[#allocation8 + $0x30] sm:$0xf] }
  0x39   :  { %417 = vmatmul.bf16.vlgmr.msra.gmra.mxu0 %v112_v41  ;;  %457 = vmatpush.bf16.msra.mxu3 %v1187_v47  ;;  %v1656_v20 = vld [vmem:[#allocation5 + $0x124] sm:$0xf]  ;;  %v1320_v21 = vld [vmem:[#allocation5 + $0x128] sm:$0xf0]  ;;  %v1675_v24 = vld [vmem:[#allocation8 + $0x34] sm:$0xf0]  ;;  %v1259_v25 = vor.u32 %v1640_v18, %v1256_v19 }
  0x3a   :  { %465 = vmatpush.bf16.msrb.mxu0 %v1299_v36  ;;  %431 = vmatmul.bf16.vlgmr.msra.gmra.mxu1 %v1997_v46  ;;  %v1323_v26 = vor.u32 %v1656_v20, %v1320_v21  ;;  %v1638_v27 = vld [vmem:[#allocation5 + $0x94] sm:$0xf]  ;;  %v1248_v28 = vld [vmem:[#allocation5 + $0x98] sm:$0xf0]  ;;  %v1391_v31 = vor.u32 %v1675_v24, %v1390_v23  ;;  %v1382_v32 = vld [vmem:[#allocation8 + $0x20] sm:$0xf] }
  0x3b   :  { %479 = vmatpush.bf16.msrb.mxu1 %v1363_v37  ;;  %445 = vmatmul.bf16.vlgmr.msra.gmra.mxu2 %v1995_v45  ;;  %v1654_v29 = vld [vmem:[#allocation5 + $0x114] sm:$0xf]  ;;  %v1312_v30 = vld [vmem:[#allocation5 + $0x118] sm:$0xf0]  ;;  %v1673_v33 = vld [vmem:[#allocation8 + $0x24] sm:$0xf0]  ;;  %v1251_v34 = vor.u32 %v1638_v27, %v1248_v28 }
  0x3c   :  { %697 = vmatpush.bf16.msrb.mxu2 %v1423_v58  ;;  %v1315_v35 = vor.u32 %v1654_v29, %v1312_v30  ;;  %v1636_v36 = vld [vmem:[#allocation5 + $0x84] sm:$0xf]  ;;  %v1240_v37 = vld [vmem:[#allocation5 + $0x88] sm:$0xf0]  ;;  %v1682_v40 = vld [vmem:[#allocation8 + $0x74] sm:$0xf] }
  0x3d   :  { %458 = vmatpush.bf16.msra.mxu3 %v1179_v61  ;;  %v1652_v38 = vld [vmem:[#allocation5 + $0x104] sm:$0xf]  ;;  %v1304_v39 = vld [vmem:[#allocation5 + $0x108] sm:$0xf0]  ;;  %v1424_v42 = vld [vmem:[#allocation8 + $0x78] sm:$0xf0]  ;;  %v1243_v47 = vor.u32 %v1636_v36, %v1240_v37 }
  0x3e   :  { %466 = vmatpush.bf16.msrb.mxu0 %v1291_v50  ;;  %v1374_v43 = vld [vmem:[#allocation8 + $0x10] sm:$0xf]  ;;  %v1671_v44 = vld [vmem:[#allocation8 + $0x14] sm:$0xf0]  ;;  %v1307_v48 = vor.u32 %v1652_v38, %v1304_v39  ;;  %v1427_v49 = vor.u32 %v1682_v40, %v1424_v42  ;;  %v1416_v52 = vld [vmem:[#allocation8 + $0x68] sm:$0xf0] }
  0x3f   :  { %480 = vmatpush.bf16.msrb.mxu1 %v1355_v51  ;;  %v1375_v50 = vor.u32 %v1671_v44, %v1374_v43  ;;  %v1680_v51 = vld [vmem:[#allocation8 + $0x64] sm:$0xf]  ;;  %v1678_v54 = vld [vmem:[#allocation8 + $0x54] sm:$0xf]  ;;  %v1408_v55 = vld [vmem:[#allocation8 + $0x58] sm:$0xf0] }
  0x40   :  { %698 = vmatpush.bf16.msrb.mxu2 %v1415_v4  ;;  %459 = vmatmul.bf16.vlgmr.msra.gmra.mxu3 %v112_v41  ;;  %v1383_v41 = vor.u32 %v1673_v33, %v1382_v32  ;;  %v1419_v53 = vor.u32 %v1680_v51, %v1416_v52  ;;  %v1411_v56 = vor.u32 %v1678_v54, %v1408_v55  ;;  %v1676_v57 = vld [vmem:[#allocation8 + $0x44] sm:$0xf]  ;;  %v1400_v58 = vld [vmem:[#allocation8 + $0x48] sm:$0xf0]  ;;  %v1674_v60 = vld [vmem:[#allocation8 + $0x34] sm:$0xf] }
  0x41   :  { %v1403_v59 = vor.u32 %v1676_v57, %v1400_v58  ;;  %v1392_v61 = vld [vmem:[#allocation8 + $0x38] sm:$0xf0]  ;;  %v1384_v0 = vld [vmem:[#allocation8 + $0x28] sm:$0xf0]  ;;  %v1670_v2 = vld [vmem:[#allocation8 + $0x14] sm:$0xf] }
  0x42   :  { %467 = vmatpush.bf16.msrb.mxu0 %v1283_v62  ;;  %v1395_v62 = vor.u32 %v1674_v60, %v1392_v61  ;;  %v1376_v3 = vld [vmem:[#allocation8 + $0x18] sm:$0xf0]  ;;  %v1699_v4 = vld [vmem:[#allocation8 + $0xf4] sm:$0xf0]  ;;  %v1698_v5 = vld [vmem:[#allocation8 + $0xf4] sm:$0xf] }
  0x43   :  { %481 = vmatpush.bf16.msrb.mxu1 %v1347_v63  ;;  %v1672_v63 = vld [vmem:[#allocation8 + $0x24] sm:$0xf]  ;;  %v1366_v9 = vld [vmem:[#allocation8] sm:$0xf]  ;;  %v1669_v10 = vld [vmem:[#allocation8 + $0x4] sm:$0xf0] }
  0x44   :  { %699 = vmatpush.bf16.msrb.mxu2 %v1407_v13  ;;  %v1387_v1 = vor.u32 %v1672_v63, %v1384_v0  ;;  %v1668_v11 = vld [vmem:[#allocation8 + $0x4] sm:$0xf]  ;;  %v1367_v12 = vor.u32 %v1669_v10, %v1366_v9  ;;  %v1368_v13 = vld [vmem:[#allocation8 + $0x8] sm:$0xf0]  ;;  %v1478_v14 = vld [vmem:[#allocation8 + $0xe0] sm:$0xf] }
  0x45   :  { %v1697_v15 = vld [vmem:[#allocation8 + $0xe4] sm:$0xf0]  ;;  %v1696_v18 = vld [vmem:[#allocation8 + $0xe4] sm:$0xf]  ;;  %v1480_v19 = vld [vmem:[#allocation8 + $0xe8] sm:$0xf0] }
  0x46   :  { %468 = vmatpush.bf16.msrb.mxu0 %v1275_v7  ;;  %v1488_v7 = vld [vmem:[#allocation8 + $0xf8] sm:$0xf0]  ;;  %v1550_v20 = vld [vmem:[#allocation10 + $0x70] sm:$0xf]  ;;  %v1483_v21 = vor.u32 %v1696_v18, %v1480_v19  ;;  %v1714_v23 = vld [vmem:[#allocation10 + $0x74] sm:$0xf] }
  0x47   :  { %482 = vmatpush.bf16.msrb.mxu1 %v1339_v8  ;;  %v1491_v8 = vor.u32 %v1698_v5, %v1488_v7  ;;  %v1552_v24 = vld [vmem:[#allocation10 + $0x78] sm:$0xf0]  ;;  %v1470_v27 = vld [vmem:[#allocation8 + $0xd0] sm:$0xf]  ;;  %v1695_v28 = vld [vmem:[#allocation8 + $0xd4] sm:$0xf0] }
  0x48   :  { %700 = vmatpush.bf16.msrb.mxu2 %v1399_v22  ;;  %v1715_v22 = vld [vmem:[#allocation10 + $0x74] sm:$0xf0]  ;;  %v1694_v29 = vld [vmem:[#allocation8 + $0xd4] sm:$0xf]  ;;  %v1471_v30 = vor.u32 %v1695_v28, %v1470_v27  ;;  %v1542_v32 = vld [vmem:[#allocation10 + $0x60] sm:$0xf] }
  0x49   :  { %v1713_v33 = vld [vmem:[#allocation10 + $0x64] sm:$0xf0]  ;;  %v1712_v36 = vld [vmem:[#allocation10 + $0x64] sm:$0xf]  ;;  %v1544_v37 = vld [vmem:[#allocation10 + $0x68] sm:$0xf0] }
  0x4a   :  { %469 = vmatpush.bf16.msrb.mxu0 %v1267_v16  ;;  %v1371_v16 = vor.u32 %v1668_v11, %v1368_v13  ;;  %v1547_v38 = vor.u32 %v1712_v36, %v1544_v37  ;;  %v1462_v39 = vld [vmem:[#allocation8 + $0xc0] sm:$0xf]  ;;  %v1693_v40 = vld [vmem:[#allocation8 + $0xc4] sm:$0xf0]  ;;  %v1464_v43 = vld [vmem:[#allocation8 + $0xc8] sm:$0xf0] }
  0x4b   :  { %483 = vmatpush.bf16.msrb.mxu1 %v1331_v17  ;;  %v1479_v17 = vor.u32 %v1697_v15, %v1478_v14  ;;  %v1463_v42 = vor.u32 %v1693_v40, %v1462_v39  ;;  %v1534_v44 = vld [vmem:[#allocation10 + $0x50] sm:$0xf]  ;;  %v1536_v51 = vld [vmem:[#allocation10 + $0x58] sm:$0xf0]  ;;  %v1691_v54 = vld [vmem:[#allocation8 + $0xb4] sm:$0xf0] }
  0x4c   :  { %701 = vmatpush.bf16.msrb.mxu2 %v1391_v31  ;;  %v1472_v31 = vld [vmem:[#allocation8 + $0xd8] sm:$0xf0]  ;;  %v1690_v55 = vld [vmem:[#allocation8 + $0xb4] sm:$0xf]  ;;  %v1526_v58 = vld [vmem:[#allocation10 + $0x40] sm:$0xf] }
  0x4d   :  { %v1456_v57 = vld [vmem:[#allocation8 + $0xb8] sm:$0xf0]  ;;  %v1528_v63 = vld [vmem:[#allocation10 + $0x48] sm:$0xf0]  ;;  %v1707_v7 = vld [vmem:[#allocation10 + $0x34] sm:$0xf0] }
  0x4e   :  { %470 = vmatpush.bf16.msrb.mxu0 %v1259_v25  ;;  %v1551_v25 = vor.u32 %v1715_v22, %v1550_v20  ;;  %v1459_v60 = vor.u32 %v1690_v55, %v1456_v57  ;;  %v2003_v5 = vld [vmem:[#allocation7] sm:$0x3]  ;;  %v1687_v13 = vld [vmem:[#allocation8 + $0x94] sm:$0xf0]  ;;  %v1686_v14 = vld [vmem:[#allocation8 + $0x94] sm:$0xf] }
  0x4f   :  { %484 = vmatpush.bf16.msrb.mxu1 %v1323_v26  ;;  %v1555_v26 = vor.u32 %v1714_v23, %v1552_v24  ;;  %v1520_v9 = vld [vmem:[#allocation10 + $0x38] sm:$0xf0]  ;;  %v1705_v18 = vld [vmem:[#allocation10 + $0x24] sm:$0xf0]  ;;  %v1512_v22 = vld [vmem:[#allocation10 + $0x28] sm:$0xf0] }
  0x50   :  { %702 = vmatpush.bf16.msrb.mxu2 %v1383_v41  ;;  %v1692_v41 = vld [vmem:[#allocation8 + $0xc4] sm:$0xf]  ;;  %v165_v24 = vperm.slane %v2003_v5, 0  ;;  %v1614_v36 = vld [vmem:[#allocation10 + $0xf0] sm:$0xf]  ;;  %vm1149_vm10 = vcmask 1047559  }
  0x51   :  { %v1684_v27 = vld [vmem:[#allocation8 + $0x84] sm:$0xf]  ;;  %v1730_v39 = vld [vmem:[#allocation10 + $0xf4] sm:$0xf]  ;;  %v1616_v40 = vld [vmem:[#allocation10 + $0xf8] sm:$0xf0] }
  0x52   :  { %471 = vmatpush.bf16.msrb.mxu0 %v1251_v34  ;;  %v1475_v34 = vor.u32 %v1694_v29, %v1472_v31  ;;  %v1432_v29 = vld [vmem:[#allocation8 + $0x88] sm:$0xf0]  ;;  %v1703_v31 = vld [vmem:[#allocation10 + $0x14] sm:$0xf0] }
  0x53   :  { %485 = vmatpush.bf16.msrb.mxu1 %v1315_v35  ;;  %v1543_v35 = vor.u32 %v1713_v33, %v1542_v32  ;;  %v1435_v32 = vor.u32 %v1684_v27, %v1432_v29  ;;  %v1608_v57 = vld [vmem:[#allocation10 + $0xe8] sm:$0xf0] }
  0x54   :  { %703 = vmatpush.bf16.msrb.mxu2 %v1375_v50  ;;  %v1710_v50 = vld [vmem:[#allocation10 + $0x54] sm:$0xf] }
  0x55   :  { %v1539_v52 = vor.u32 %v1710_v50, %v1536_v51  ;;  %v1496_v51 = vld [vmem:[#allocation10 + $0x8] sm:$0xf0] }
  0x56   :  { %472 = vmatpush.bf16.msrb.mxu0 %v1243_v47  ;;  %v1711_v47 = vld [vmem:[#allocation10 + $0x54] sm:$0xf0] }
  0x57   :  { %486 = vmatpush.bf16.msrb.mxu1 %v1307_v48  ;;  %v1467_v48 = vor.u32 %v1692_v41, %v1464_v43  ;;  %v1619_v43 = vor.u32 %v1730_v39, %v1616_v40  ;;  %v1717_v39 = vld [vmem:[#allocation10 + $0x84] sm:$0xf0]  ;;  %v1716_v40 = vld [vmem:[#allocation10 + $0x84] sm:$0xf] }
  0x58   :  { %704 = vmatpush.bf16.msrb.mxu2 %v1367_v12  ;;  %v1438_v12 = vld [vmem:[#allocation8 + $0x90] sm:$0xf] }
  0x59   :  { %473 = vmatmul.bf16.vlgmr.msrb.gmra.mxu0 %v1997_v46  ;;  %v1379_v46 = vor.u32 %v1670_v2, %v1376_v3  ;;  %v1689_v2 = vld [vmem:[#allocation8 + $0xa4] sm:$0xf0]  ;;  %v1439_v15 = vor.u32 %v1687_v13, %v1438_v12 }
  0x5a   :  { %725 = vmatpush.bf16.msra.mxu0 %v1427_v49  ;;  %487 = vmatmul.bf16.vlgmr.msrb.gmra.mxu1 %v1995_v45  ;;  %v1486_v45 = vld [vmem:[#allocation8 + $0xf0] sm:$0xf]  ;;  %v1535_v49 = vor.u32 %v1711_v47, %v1534_v44  ;;  %v1494_v44 = vld [vmem:[#allocation10] sm:$0xf]  ;;  %v1701_v47 = vld [vmem:[#allocation10 + $0x4] sm:$0xf0] }
  0x5b   :  { %v1487_v6 = vor.u32 %v1699_v4, %v1486_v45  ;;  %739 = vmatpush.bf16.msra.mxu1 %v1491_v8  ;;  %v1448_v45 = vld [vmem:[#allocation8 + $0xa8] sm:$0xf0]  ;;  %v1518_v4 = vld [vmem:[#allocation10 + $0x30] sm:$0xf]  ;;  %v1706_v8 = vld [vmem:[#allocation10 + $0x34] sm:$0xf]  ;;  %v1495_v50 = vor.u32 %v1701_v47, %v1494_v44 }
  0x5c   :  { %955 = vmatpush.bf16.msra.mxu2 %v1551_v25  ;;  %v1519_v10 = vor.u32 %v1707_v7, %v1518_v4  ;;  %v1523_v11 = vor.u32 %v1706_v8, %v1520_v9  ;;  %v1430_v25 = vld [vmem:[#allocation8 + $0x80] sm:$0xf]  ;;  %v1725_v7 = vld [vmem:[#allocation10 + $0xc4] sm:$0xf0]  ;;  %v1724_v8 = vld [vmem:[#allocation10 + $0xc4] sm:$0xf] }
  0x5d   :  { %711 = vmatpush.bf16.msrb.mxu3 %v1487_v6 }
  0x5e   :  { %726 = vmatpush.bf16.msra.mxu0 %v1419_v53  ;;  %v1454_v53 = vld [vmem:[#allocation8 + $0xb0] sm:$0xf] }
  0x5f   :  { %740 = vmatpush.bf16.msra.mxu1 %v1483_v21  ;;  %v1704_v21 = vld [vmem:[#allocation10 + $0x24] sm:$0xf] }
  0x60   :  { %956 = vmatpush.bf16.msra.mxu2 %v1543_v35  ;;  %v1515_v23 = vor.u32 %v1704_v21, %v1512_v22  ;;  %v1504_v35 = vld [vmem:[#allocation10 + $0x18] sm:$0xf0]  ;;  %v1574_v22 = vld [vmem:[#allocation10 + $0xa0] sm:$0xf] }
  0x61   :  { %712 = vmatpush.bf16.msrb.mxu3 %v1479_v17  ;;  %v1510_v17 = vld [vmem:[#allocation10 + $0x20] sm:$0xf] }
  0x62   :  { %727 = vmatpush.bf16.msra.mxu0 %v1411_v56  ;;  %v1455_v56 = vor.u32 %v1691_v54, %v1454_v53  ;;  %v1511_v20 = vor.u32 %v1705_v18, %v1510_v17  ;;  %v1729_v53 = vld [vmem:[#allocation10 + $0xe4] sm:$0xf0]  ;;  %v1584_v18 = vld [vmem:[#allocation10 + $0xb8] sm:$0xf0] }
  0x63   :  { %741 = vmatpush.bf16.msra.mxu1 %v1475_v34  ;;  %v1702_v34 = vld [vmem:[#allocation10 + $0x14] sm:$0xf] }
  0x64   :  { %957 = vmatpush.bf16.msra.mxu2 %v1535_v49  ;;  %v1507_v37 = vor.u32 %v1702_v34, %v1504_v35  ;;  %v1568_v34 = vld [vmem:[#allocation10 + $0x98] sm:$0xf0] }
  0x65   :  { %713 = vmatpush.bf16.msrb.mxu3 %v1471_v30  ;;  %v1502_v30 = vld [vmem:[#allocation10 + $0x10] sm:$0xf] }
  0x66   :  { %728 = vmatpush.bf16.msra.mxu0 %v1403_v59  ;;  %v1709_v59 = vld [vmem:[#allocation10 + $0x44] sm:$0xf0]  ;;  %v1503_v33 = vor.u32 %v1703_v31, %v1502_v30  ;;  %v1566_v30 = vld [vmem:[#allocation10 + $0x90] sm:$0xf] }
  0x67   :  { %742 = vmatpush.bf16.msra.mxu1 %v1467_v48  ;;  %v1527_v61 = vor.u32 %v1709_v59, %v1526_v58  ;;  %v1700_v48 = vld [vmem:[#allocation10 + $0x4] sm:$0xf] }
  0x68   :  { %v1499_v54 = vor.u32 %v1700_v48, %v1496_v51 }
  0x69   :  { %714 = vmatpush.bf16.msrb.mxu3 %v1463_v42  ;;  %958 = vmatpush.bf16.msra.mxu2 %v1527_v61  ;;  %v1727_v61 = vld [vmem:[#allocation10 + $0xd4] sm:$0xf0] }
  0x6a   :  { %729 = vmatpush.bf16.msra.mxu0 %v1395_v62  ;;  %v1708_v62 = vld [vmem:[#allocation10 + $0x44] sm:$0xf] }
  0x6b   :  { %v1531_v0 = vor.u32 %v1708_v62, %v1528_v63  ;;  %743 = vmatpush.bf16.msra.mxu1 %v1459_v60  ;;  %v1598_v60 = vld [vmem:[#allocation10 + $0xd0] sm:$0xf]  ;;  %v1726_v62 = vld [vmem:[#allocation10 + $0xd4] sm:$0xf] }
  0x6c   :  { %v1599_v63 = vor.u32 %v1727_v61, %v1598_v60 }
  0x6d   :  { %715 = vmatpush.bf16.msrb.mxu3 %v1455_v56  ;;  %959 = vmatpush.bf16.msra.mxu2 %v1519_v10  ;;  %v1728_v56 = vld [vmem:[#allocation10 + $0xe4] sm:$0xf]  ;;  %v1592_v10 = vld [vmem:[#allocation10 + $0xc8] sm:$0xf0] }
  0x6e   :  { %730 = vmatpush.bf16.msra.mxu0 %v1387_v1  ;;  %v1446_v1 = vld [vmem:[#allocation8 + $0xa0] sm:$0xf]  ;;  %v1611_v59 = vor.u32 %v1728_v56, %v1608_v57  ;;  %v1595_v12 = vor.u32 %v1724_v8, %v1592_v10 }
  0x6f   :  { %v1447_v3 = vor.u32 %v1689_v2, %v1446_v1 }
  0x71   :  { %716 = vmatpush.bf16.msrb.mxu3 %v1447_v3  ;;  %960 = vmatpush.bf16.msra.mxu2 %v1511_v20 }
  0x72   :  { %731 = vmatpush.bf16.msra.mxu0 %v1379_v46  ;;  %v1688_v46 = vld [vmem:[#allocation8 + $0xa4] sm:$0xf] }
  0x73   :  { %v1451_v6 = vor.u32 %v1688_v46, %v1448_v45 }
  0x75   :  { %744 = vmatpush.bf16.msra.mxu1 %v1451_v6  ;;  %717 = vmatpush.bf16.msrb.mxu3 %v1439_v15  ;;  %v1590_v6 = vld [vmem:[#allocation10 + $0xc0] sm:$0xf]  ;;  %v1723_v15 = vld [vmem:[#allocation10 + $0xb4] sm:$0xf0] }
  0x76   :  { %732 = vmatpush.bf16.msra.mxu0 %v1371_v16  ;;  %v1440_v16 = vld [vmem:[#allocation8 + $0x98] sm:$0xf0]  ;;  %961 = vmatpush.bf16.msra.mxu2 %v1503_v33  ;;  %v1591_v9 = vor.u32 %v1725_v7, %v1590_v6  ;;  %v1718_v33 = vld [vmem:[#allocation10 + $0x94] sm:$0xf]  ;;  %v531_v6 = vld [vmem:[%s2053_s4] sm:$0x3] }
  0x77   :  { %v1443_v19 = vor.u32 %v1686_v14, %v1440_v16  ;;  %v1582_v14 = vld [vmem:[#allocation10 + $0xb0] sm:$0xf]  ;;  %v1722_v16 = vld [vmem:[#allocation10 + $0xb4] sm:$0xf] }
  0x78   :  { %v1583_v17 = vor.u32 %v1723_v15, %v1582_v14  ;;  %v1587_v21 = vor.u32 %v1722_v16, %v1584_v18  ;;  %v533_v16 = vperm.slane %v531_v6, 0 }
  0x79   :  { %745 = vmatpush.bf16.msra.mxu1 %v1443_v19 }
  0x7a   :  { %983 = vmatpush.bf16.msrb.mxu0 %v1555_v26  ;;  %v1685_v26 = vld [vmem:[#allocation8 + $0x84] sm:$0xf0]  ;;  %962 = vmatpush.bf16.msra.mxu2 %v1495_v50 }
  0x7b   :  { %v1431_v28 = vor.u32 %v1685_v26, %v1430_v25  ;;  %v1720_v25 = vld [vmem:[#allocation10 + $0xa4] sm:$0xf]  ;;  %v1576_v26 = vld [vmem:[#allocation10 + $0xa8] sm:$0xf0] }
  0x7c   :  { %v1579_v29 = vor.u32 %v1720_v25, %v1576_v26 }
  0x7d   :  { %718 = vmatpush.bf16.msrb.mxu3 %v1431_v28  ;;  %746 = vmatpush.bf16.msra.mxu1 %v1435_v32  ;;  %v1719_v32 = vld [vmem:[#allocation10 + $0x94] sm:$0xf0] }
  0x7e   :  { %984 = vmatpush.bf16.msrb.mxu0 %v1547_v38  ;;  %v1731_v38 = vld [vmem:[#allocation10 + $0xf4] sm:$0xf0]  ;;  %v1567_v35 = vor.u32 %v1719_v32, %v1566_v30 }
  0x7f   :  { %v1615_v42 = vor.u32 %v1731_v38, %v1614_v36  ;;  %v1571_v36 = vor.u32 %v1718_v33, %v1568_v34 }
  0x81   :  { %969 = vmatpush.bf16.msra.mxu3 %v1615_v42  ;;  %997 = vmatpush.bf16.msrb.mxu1 %v1619_v43  ;;  %v166_v42 = vperm.slane %v2003_v5, 1 }
  0x82   :  { %985 = vmatpush.bf16.msrb.mxu0 %v1539_v52  ;;  %v1606_v52 = vld [vmem:[#allocation10 + $0xe0] sm:$0xf] }
  0x83   :  { %v1607_v55 = vor.u32 %v1729_v53, %v1606_v52 }
  0x85   :  { %970 = vmatpush.bf16.msra.mxu3 %v1607_v55  ;;  %998 = vmatpush.bf16.msrb.mxu1 %v1611_v59 }
  0x86   :  { %986 = vmatpush.bf16.msrb.mxu0 %v1531_v0  ;;  %v1600_v0 = vld [vmem:[#allocation10 + $0xd8] sm:$0xf0] }
  0x87   :  { %v1603_v3 = vor.u32 %v1726_v62, %v1600_v0 }
  0x89   :  { %971 = vmatpush.bf16.msra.mxu3 %v1599_v63  ;;  %999 = vmatpush.bf16.msrb.mxu1 %v1603_v3 }
  0x8a   :  { %987 = vmatpush.bf16.msrb.mxu0 %v1523_v11 }
  0x8d   :  { %972 = vmatpush.bf16.msra.mxu3 %v1591_v9  ;;  %1000 = vmatpush.bf16.msrb.mxu1 %v1595_v12 }
  0x8e   :  { %988 = vmatpush.bf16.msrb.mxu0 %v1515_v23 }
  0x91   :  { %973 = vmatpush.bf16.msra.mxu3 %v1583_v17  ;;  %1001 = vmatpush.bf16.msrb.mxu1 %v1587_v21 }
  0x92   :  { %989 = vmatpush.bf16.msrb.mxu0 %v1507_v37  ;;  %v1558_v37 = vld [vmem:[#allocation10 + $0x80] sm:$0xf] }
  0x93   :  { %v1559_v43 = vor.u32 %v1717_v39, %v1558_v37 }
  0x95   :  { %1002 = vmatpush.bf16.msrb.mxu1 %v1579_v29 }
  0x96   :  { %990 = vmatpush.bf16.msrb.mxu0 %v1499_v54 }
  0x99   :  { %1003 = vmatpush.bf16.msrb.mxu1 %v1571_v36 }
  0xb6   :  { %v418_v41 = vpop.f32.mrf.mxu0 }
  0xb7   :  { %v432_v49 = vpop.f32.mrf.mxu1  ;;  %v419_v58 = vadd.f32 %v418_v41, %v165_v24  ;;  %v1560_v41 = vld [vmem:[#allocation10 + $0x88] sm:$0xf0] }
  0xb8   :  { %v1563_v44 = vor.u32 %v1716_v40, %v1560_v41  ;;  %v1031_v40 = vld [vmem:[%s2056_s7] sm:$0x3]  ;;  %s1925_s7 = smov [#allocation11]  }
  0xb9   :  { %v433_v1 = vadd.f32 %v432_v49, %v419_v58  ;;  %s1158_s11 = sshll.u32 %s1925_s7, 4  ;;  %s1159_s11 = int_to_ptr.vmem [resolvable:$true] %s1158_s11 }
  0xba   :  { %1004 = vmatpush.bf16.msrb.mxu1 %v1563_v44 }
  0xbe   :  { %v446_v2 = vpop.f32.mrf.mxu2  ;;  %v420_v46 = vpop.f32.mrf.mxu0 }
  0xbf   :  { %v421_v45 = vadd.f32 %v420_v46, %v165_v24  ;;  %v434_v4 = vpop.f32.mrf.mxu1  ;;  %v2006_v11 = vadd.f32 %v446_v2, %v433_v1  ;;  %v1721_v24 = vld [vmem:[#allocation10 + $0xa4] sm:$0xf0]  ;;  %v789_v2 = vld [vmem:[%s2055_s6] sm:$0x3] }
  0xc0   :  { %v1575_v28 = vor.u32 %v1721_v24, %v1574_v22  ;;  %v791_v10 = vperm.slane %v789_v2, 0 }
  0xc1   :  { %v435_v13 = vadd.f32 %v434_v4, %v421_v45  ;;  %v493_v19 = vmax.f32 %v2006_v11, 0.0  ;;  %v792_v45 = vperm.slane %v789_v2, 1 }
  0xc2   :  { %974 = vmatpush.bf16.msra.mxu3 %v1575_v28 }
  0xc3   :  { %v460_v38 = vpop.f32.mrf.mxu3 }
  0xc4   :  { %v461_v49 = vadd.f32 %v460_v38, %v166_v42 }
  0xc6   :  { %v448_v20 = vpop.f32.mrf.mxu2  ;;  %975 = vmatpush.bf16.msra.mxu3 %v1567_v35 }
  0xc7   :  { %v2009_v23 = vadd.f32 %v448_v20, %v435_v13  ;;  %v534_v13 = vperm.slane %v531_v6, 1 }
  0xc9   :  { %v495_v27 = vmax.f32 %v2009_v23, 0.0 }
  0xca   :  { %976 = vmatpush.bf16.msra.mxu3 %v1559_v43 }
  0xcb   :  { %v497_v31 = vpack.c.bf16 %v495_v27, %v493_v19  ;;  %v462_v50 = vpop.f32.mrf.mxu3 }
  0xcc   :  { %v463_v52 = vadd.f32 %v462_v50, %v166_v42 }
  0xcd   :  { %705 = vmatmul.bf16.vlgmr.msrb.gmra.mxu2 %v497_v31  ;;  %733 = vmatmul.bf16.vlgmr.msra.gmra.mxu0 %v497_v31 }
  0xd6   :  { %v474_v47 = vpop.f32.mrf.mxu0 }
  0xd7   :  { %v488_v48 = vpop.f32.mrf.mxu1  ;;  %v475_v51 = vadd.f32 %v474_v47, %v461_v49 }
  0xd9   :  { %v2017_v54 = vadd.f32 %v488_v48, %v475_v51  ;;  %v1034_v51 = vperm.slane %v1031_v40, 1 }
  0xdb   :  { %v494_v57 = vmax.f32 %v2017_v54, 0.0 }
  0xdd   :  { %963 = vmatmul.bf16.vlgmr.msra.gmra.mxu2 %v497_v31  ;;  %991 = vmatmul.bf16.vlgmr.msrb.gmra.mxu0 %v497_v31 }
  0xde   :  { %v476_v53 = vpop.f32.mrf.mxu0 }
  0xdf   :  { %v477_v55 = vadd.f32 %v476_v53, %v463_v52  ;;  %v490_v56 = vpop.f32.mrf.mxu1 }
  0xe1   :  { %v2019_v5 = vadd.f32 %v490_v56, %v477_v55  ;;  %v1033_v56 = vperm.slane %v1031_v40, 0 }
  0xe3   :  { %v496_v58 = vmax.f32 %v2019_v5, 0.0 }
  0xe5   :  { %v498_v59 = vpack.c.bf16 %v496_v58, %v494_v57 }
  0xe7   :  { %719 = vmatmul.bf16.vlgmr.msrb.gmra.mxu3 %v498_v59  ;;  %747 = vmatmul.bf16.vlgmr.msra.gmra.mxu1 %v498_v59 }
  0xf7   :  { %977 = vmatmul.bf16.vlgmr.msra.gmra.mxu3 %v498_v59  ;;  %1005 = vmatmul.bf16.vlgmr.msrb.gmra.mxu1 %v498_v59 }
 0x14a   :  { %v734_v60 = vpop.f32.mrf.mxu0 }
 0x14b   :  { %v735_v18 = vadd.f32 %v734_v60, %v534_v13 }
 0x150   :  { %v706_v61 = vpop.f32.mrf.mxu2 }
 0x151   :  { %v707_v26 = vadd.f32 %v706_v61, %v533_v16 }
 0x152   :  { %v736_v62 = vpop.f32.mrf.mxu0 }
 0x153   :  { %v737_v37 = vadd.f32 %v736_v62, %v534_v13 }
 0x158   :  { %v708_v0 = vpop.f32.mrf.mxu2 }
 0x159   :  { %v709_v42 = vadd.f32 %v708_v0, %v533_v16 }
 0x15a   :  { %v992_v46 = vpop.f32.mrf.mxu0 }
 0x15b   :  { %v993_v7 = vadd.f32 %v992_v46, %v792_v45 }
 0x160   :  { %v964_v8 = vpop.f32.mrf.mxu2 }
 0x161   :  { %v965_v17 = vadd.f32 %v964_v8, %v791_v10 }
 0x162   :  { %v994_v15 = vpop.f32.mrf.mxu0 }
 0x163   :  { %v995_v21 = vadd.f32 %v994_v15, %v792_v45 }
 0x164   :  { %v748_v63 = vpop.f32.mrf.mxu1 }
 0x165   :  { %v749_v24 = vadd.f32 %v748_v63, %v735_v18 }
 0x168   :  { %v966_v30 = vpop.f32.mrf.mxu2 }
 0x169   :  { %v967_v35 = vadd.f32 %v966_v30, %v791_v10  ;;  %v1048_v10 = vlaneseq }
 0x16a   :  { %v720_v1 = vpop.f32.mrf.mxu3 }
 0x16b   :  { %v721_v32 = vadd.f32 %v720_v1, %v707_v26 }
 0x16c   :  { %v750_v3 = vpop.f32.mrf.mxu1 }
 0x16d   :  { %v751_v43 = vadd.f32 %v750_v3, %v737_v37 }
 0x172   :  { %v722_v4 = vpop.f32.mrf.mxu3 }
 0x173   :  { %v723_v50 = vadd.f32 %v722_v4, %v709_v42 }
 0x174   :  { %v1006_v9 = vpop.f32.mrf.mxu1 }
 0x175   :  { %v1007_v12 = vadd.f32 %v1006_v9, %v993_v7 }
 0x177   :  { %v1012_v14 = vmul.f32 0.5, %v1007_v12  ;;  %v1049_v12 = vshrl.u32 %v1048_v10, 7 }
 0x179   :  { %1744 = vtanh.f32 %v1012_v14  ;;  %1742 = vset.pattern.permute.xlu2 %v1049_v12  ;;  %1743 = vset.pattern.permute.xlu0 %v1049_v12  ;;  %v1056_v14 = vand.u32 127, %v1048_v10  ;;  %vm1052_vm1 = vcmp.lt.s32.totalorder %v1049_v12, 2 }
 0x17a   :  { %v978_v20 = vpop.f32.mrf.mxu3 }
 0x17b   :  { %v979_v22 = vadd.f32 %v978_v20, %v965_v17 }
 0x17c   :  { %v1008_v25 = vpop.f32.mrf.mxu1 }
 0x17d   :  { %v1011_v28 = vmul.f32 0.5, %v979_v22  ;;  %v1009_v29 = vadd.f32 %v1008_v25, %v995_v21 }
 0x17f   :  { %v1745_v31 = vpop.eup %1744  ;;  %1746 = vtanh.f32 %v1011_v28  ;;  %v1014_v33 = vmul.f32 0.5, %v1009_v29 }
 0x180   :  { %1748 = vtanh.f32 %v749_v24  ;;  %v1020_v34 = vadd.f32 1.0, %v1745_v31 }
 0x181   :  { %1750 = vtanh.f32 %v1014_v33 }
 0x182   :  { %v980_v36 = vpop.f32.mrf.mxu3  ;;  %1752 = vtanh.f32 %v721_v32  ;;  %v1024_v39 = vmul.f32 0.5, %v1020_v34 }
 0x183   :  { %v981_v38 = vadd.f32 %v980_v36, %v967_v35 }
 0x185   :  { %v1747_v41 = vpop.eup %1746  ;;  %v1013_v44 = vmul.f32 0.5, %v981_v38 }
 0x186   :  { %v1749_v47 = vpop.eup %1748  ;;  %v1019_v48 = vadd.f32 1.0, %v1747_v41 }
 0x187   :  { %v1751_v49 = vpop.eup %1750  ;;  %1754 = vtanh.f32 %v1013_v44  ;;  %v1028_v55 = vmul.f32 %v1749_v47, %v1024_v39 }
 0x188   :  { %v1023_v52 = vmul.f32 0.5, %v1019_v48  ;;  %v1022_v53 = vadd.f32 1.0, %v1751_v49  ;;  %v1753_v59 = vpop.eup %1752  ;;  %1756 = vtanh.f32 %v751_v43 }
 0x189   :  { %1758 = vtanh.f32 %v723_v50  ;;  %v1038_v63 = vmul.f32 %v1034_v51, %v1028_v55 }
 0x18a   :  { %v1027_v60 = vmul.f32 %v1753_v59, %v1023_v52  ;;  %v1026_v61 = vmul.f32 0.5, %v1022_v53 }
 0x18c   :  { %v1037_v62 = vmul.f32 %v1033_v56, %v1027_v60 }
 0x18d   :  { %v1755_v0 = vpop.eup %1754 }
 0x18e   :  { %v1021_v1 = vadd.f32 1.0, %v1755_v0  ;;  %v1041_v2 = vadd.f32 %v1038_v63, %v1037_v62  ;;  %v1757_v3 = vpop.eup %1756 }
 0x18f   :  { %v1030_v45 = vmul.f32 %v1757_v3, %v1026_v61  ;;  %v1759_v4 = vpop.eup %1758 }
 0x190   :  { %v1025_v46 = vmul.f32 0.5, %v1021_v1  ;;  %1042 = vadd.xlane.f32.xlu0 %v1041_v2 }
 0x191   :  { %v1040_v8 = vmul.f32 %v1034_v51, %v1030_v45 }
 0x192   :  { %v1029_v6 = vmul.f32 %v1759_v4, %v1025_v46 }
 0x194   :  { %v1039_v7 = vmul.f32 %v1033_v56, %v1029_v6 }
 0x196   :  { %v1044_v9 = vadd.f32 %v1040_v8, %v1039_v7 }
 0x198   :  { %1045 = vadd.xlane.f32.xlu0 %v1044_v9 }
 0x203   :  { %v1043_v13 = vpop.xlane.xlu0 %1042 }
 0x204   :  { %v1057_v16 = vperm.slane %v1043_v13, %v1056_v14 }
 0x20b   :  { %v1046_v15 = vpop.xlane.xlu0 %1045 }
 0x20c   :  { %v1058_v17 = vperm.slane %v1046_v15, %v1056_v14 }
 0x20e   :  { %v1060_v18 = vsel %vm1059_vm0, %v1058_v17, %v1057_v16 }
 0x20f   :  { %v1062_v20 = vsel %vm1052_vm1, %v1060_v18, 0.0 }
 0x210   :  { %v1064_v21 = vsel %vm1063_vm2, %v1062_v20, -inf }
 0x211   :  { %1065 = vmax.xlane.f32.xlu1 %v1064_v21 }
 0x284   :  { %v1066_v22 = vpop.xlane.xlu1 %1065 }
 0x285   :  { %v1067_v24 = vsub.f32 %v1062_v20, %v1066_v22 }
 0x287   :  { %v1068_v25 = vmul.f32 1.442695, %v1067_v24 }
 0x289   :  { %1760 = vpow2.f32 %v1068_v25 }
 0x28f   :  { %v1761_v26 = vpop.eup %1760 }
 0x290   :  { %v1070_v28 = vsel %vm1063_vm2, %v1761_v26, 0.0 }
 0x291   :  { %1071 = vadd.xlane.f32.xlu1 %v1070_v28 }
 0x304   :  { %v1072_v29 = vpop.xlane.xlu1 %1071 }
 0x305   :  { %1762 = vrcp.f32 %v1072_v29  ;;  %v1084_v33 = vand.u32 2147483648, %v1072_v29  ;;  %v1082_v35 = vand.u32 2147483647, %v1072_v29  ;;  %vm1078_vm4 = vweird.f32 %v1072_v29 }
 0x307   :  { %v1085_v37 = vor.u32 1.1754944e-38, %v1084_v33  ;;  %vm1083_vm6 = vcmp.eq.f32.partialorder %v1082_v35, 8.507059e+37 }
 0x30b   :  { %v1763_v30 = vpop.eup %1762 }
 0x30c   :  { %v1074_v31 = vmul.f32 %v1763_v30, %v1072_v29  ;;  %vm1079_vm3 = vweird.f32 %v1763_v30 }
 0x30d   :  { %vm1080_vm5 = vmor %vm1078_vm4, %vm1079_vm3 }
 0x30e   :  { %v1075_v32 = vsub.f32 1.0, %v1074_v31 }
 0x310   :  { %v1076_v34 = vmul.f32 %v1763_v30, %v1075_v32 }
 0x312   :  { %v1077_v36 = vadd.f32 %v1763_v30, %v1076_v34 }
 0x314   :  { %v1081_v38 = vsel %vm1080_vm5, %v1763_v30, %v1077_v36 }
 0x315   :  { %v1086_v39 = vsel %vm1083_vm6, %v1085_v37, %v1081_v38 }
 0x316   :  { %v1087_v40 = vmul.f32 %v1761_v26, %v1086_v39 }
 0x318   :  { %v1095_v41 = vperm.slane %v1087_v40, 1  ;;  %v1088_v42 = vperm.slane %v1087_v40, 0 }
 0x31a   :  { %1100 = vperm.xlu2 %1742, %v1095_v41  }
 0x322   :  { %1093 = vperm.xlu2 %1742, %v1088_v42  }
 0x374   :  { %v1101_v43 = vpop.permute.xlu2 %1100 }
 0x375   :  { %v1104_v44 = vmul.f32 %v1101_v43, %v495_v27  ;;  %v1105_v47 = vmul.f32 %v1101_v43, %v496_v58 }
 0x377   :  { %v1118_v48 = vrot.slane %v1104_v44, 4  ;;  %v1124_v49 = vrot.slane %v1105_v47, 4 }
 0x379   :  { %v1119_v50 = vadd.f32 %v1118_v48, %v1104_v44  ;;  %v1125_v51 = vadd.f32 %v1124_v49, %v1105_v47 }
 0x37b   :  { %v1120_v52 = vrot.slane %v1119_v50, 2  ;;  %v1126_v53 = vrot.slane %v1125_v51, 2 }
 0x37c   :  { %v1094_v55 = vpop.permute.xlu2 %1093 }
 0x37d   :  { %v1127_v56 = vadd.f32 %v1126_v53, %v1125_v51  ;;  %v1102_v59 = vmul.f32 %v1094_v55, %v493_v19  ;;  %v1103_v60 = vmul.f32 %v1094_v55, %v494_v57  ;;  %v1121_v61 = vadd.f32 %v1120_v52, %v1119_v50 }
 0x37f   :  { %v1128_v23 = vrot.slane %v1127_v56, 1  ;;  %v1106_v27 = vrot.slane %v1102_v59, 4  ;;  %v1112_v62 = vrot.slane %v1103_v60, 4  ;;  %v1122_v0 = vrot.slane %v1121_v61, 1 }
 0x381   :  { %v1129_v5 = vadd.f32 %v1128_v23, %v1127_v56  ;;  %v1107_v58 = vadd.f32 %v1106_v27, %v1102_v59  ;;  %v1113_v63 = vadd.f32 %v1112_v62, %v1103_v60  ;;  %v1123_v4 = vadd.f32 %v1122_v0, %v1121_v61 }
 0x383   :  { %v1108_v1 = vrot.slane %v1107_v58, 2  ;;  %v1114_v2 = vrot.slane %v1113_v63, 2  ;;  %v1135_v3 = vrot.slane %v1129_v5, 6 }
 0x385   :  { %v1109_v46 = vadd.f32 %v1108_v1, %v1107_v58  ;;  %v1115_v45 = vadd.f32 %v1114_v2, %v1113_v63  ;;  %v1138_v6 = vsel %vm1136_vm7, %v1123_v4, %v1135_v3 }
 0x386   :  { %v1143_v8 = vrot.slane %v1138_v6, 7 }
 0x387   :  { %v1110_v11 = vrot.slane %v1109_v46, 1  ;;  %v1116_v19 = vrot.slane %v1115_v45, 1 }
 0x389   :  { %v1117_v54 = vadd.f32 %v1116_v19, %v1115_v45  ;;  %v1111_v57 = vadd.f32 %v1110_v11, %v1109_v46 }
 0x38b   :  { %v1134_v7 = vrot.slane %v1117_v54, 6 }
 0x38d   :  { %v1137_v9 = vsel %vm1136_vm7, %v1111_v57, %v1134_v7 }
 0x38e   :  { %v1144_v10 = vsel %vm1059_vm0, %v1143_v8, %v1137_v9 }
 0x38f   :  { %v1146_v12 = vsel %vm1145_vm8, %v1143_v8, %v1144_v10 }
 0x390   :  { %v1148_v13 = vsel %vm1147_vm9, %v1143_v8, %v1146_v12 }
 0x391   :  { %v1150_v14 = vsel %vm1149_vm10, %v1143_v8, %v1148_v13 }
 0x392   :  { %1152 = vst [vmem:[#allocation11] sm:$0xf] %v1150_v14 }
 0x393   :  { %1163 = dma.vmem_to_hbm [thread:$0]  %s1159_s11, 64, %s1161_s14, [#allocation4]  }
 0x394   :  { %1914 = dma.done.wait [#allocation4], 64  }
 0x395   :  { %1915 = vsyncadd [#allocation4], 4294967232 }
 0x396   :  { %1168 = vsyncpa [#allocation3], 1 }
 0x397   :  { %1169 = vsyncpa [#allocation6], 1 }
 0x398   :  { %1170 = vsyncpa [#allocation9], 1 }
 0x399   :  { %1171 = vsyncpa [#allocation4], 1 }

</bundles_post_ra>
